<compile_context>
chip_gen: v7x
topology: tpu7x:2x2x1
jax: 0.10.0
libtpu: 0.0.40
codegen_flags: <defaults>
</compile_context>

<pallas_src>
import jax
import jax.numpy as jnp
import numpy as np
from jax.experimental import pallas as pl
from jax.experimental.pallas import tpu as pltpu

STATE_DIM = 64
ACTION_DIM = 9
ACTION_PAD = 16          # pad one-hot width to a sublane-friendly size
OUT_LANES = 128          # lane-dense output: [ state(64) | reward | zeros ]
REWARD_LANE = STATE_DIM  # reward lives in lane 64 of the output slab


def _round_up(n, m):
    return ((n + m - 1) // m) * m


def _pick_tiling(batch, max_tile=1024):
    """Choose (row_tile, padded_batch).

    * row_tile is always a multiple of 8 (sublane constraint).
    * Avoids wrapper-side jnp.pad whenever the 8-rounded batch already has a
      tile-sized divisor (extra pad = a full HBM read+write pass).
    * For medium/large batches keeps >= 2 grid steps so the "parallel" batch
      axis can shard across v7x's two TensorCores.
    """
    b8 = _round_up(max(batch, 1), 8)
    if b8 <= max_tile:
        # Fits in one or two tiles without extra padding.
        if b8 >= 512 and b8 % 16 == 0:
            return b8 // 2, b8            # 2 grid steps -> both v7x TCs busy
        return b8, b8
    # Large batch: largest multiple-of-8 divisor of b8 that fits the cap.
    tb = max_tile - (max_tile % 8)
    while b8 % tb:
        tb -= 8
    if tb >= 256:
        return tb, b8                     # exact tiling, no extra padding
    # Awkward batch (e.g. 8 * large prime): pad to a round tile instead of
    # paying ~0.35 us of per-step overhead on hundreds of tiny tiles.
    tb = max_tile - (max_tile % 8)
    return tb, _round_up(b8, tb)


def dynamics_kernel(x_ref, act_ref, w1x_ref, w1a_ref, b1_ref, w2_ref, b2_ref,
                    out_ref):
    x = x_ref[...]                                   # (TB, 64)  f32
    act = act_ref[...]                               # (TB, 1)   i32
    tb = x.shape[0]

    # one_hot(action, 9) built in-kernel, padded to (TB, 16); columns 9..15
    # are never selected (action in [0, 9)) and their weight rows are zero.
    iota = jax.lax.broadcasted_iota(jnp.int32, (tb, ACTION_PAD), 1)
    oh = (iota == act).astype(jnp.float32)           # (TB, 16)

    # fc_state with the N dimension zero-padded to 128: the result is a
    # native lane-dense (TB, 128) tile whose lanes 64..127 are exactly zero
    # (zero weight columns + zero bias), so no per-tile concatenate/relayout
    # is needed for the output slab.
    s = jnp.dot(x, w1x_ref[...], preferred_element_type=jnp.float32)
    s = s + jnp.dot(oh, w1a_ref[...], preferred_element_type=jnp.float32)
    s = jnp.maximum(s + b1_ref[...], 0.0)            # (TB, 128)

    # fc_reward: tanh(new_state @ W2 + b2) on VPU (broadcast mul with the
    # zero-padded (1, 128) weight row) + XLU (lane reduce) + EUP (tanh).
    # b2 is a scalar read from SMEM.
    r = jnp.sum(s * w2_ref[...], axis=-1, keepdims=True) + b2_ref[0, 0]
    r = jnp.tanh(r)                                  # (TB, 1)

    # Slab layout: [ state(0..63) | reward @ lane 64 | zeros(65..127) ].
    lane = jax.lax.broadcasted_iota(jnp.int32, (tb, OUT_LANES), 1)
    out_ref[...] = jnp.where(lane == REWARD_LANE, r, s)   # one unmasked store


def prepare_params(w1, b1, w2, b2):
    """One-time parameter preparation (hoisted out of the per-call path).

    w1: (73, 64), b1: (64,), w2: (64, 1), b2: (1,)  -- already (in, out).
    All matmul weights / biases are zero-padded along N from 64 -> 128 lanes
    so the first layer produces the lane-dense output slab directly.
    """
    w1 = w1.astype(jnp.float32)
    w1x = jnp.zeros((STATE_DIM, OUT_LANES), jnp.float32)
    w1x = w1x.at[:, :STATE_DIM].set(w1[:STATE_DIM])                   # (64, 128)
    w1a = jnp.zeros((ACTION_PAD, OUT_LANES), jnp.float32)
    w1a = w1a.at[:ACTION_DIM, :STATE_DIM].set(w1[STATE_DIM:])         # (16, 128)
    b1_pad = jnp.zeros((1, OUT_LANES), jnp.float32)
    b1_pad = b1_pad.at[0, :STATE_DIM].set(b1.astype(jnp.float32))     # (1, 128)
    w2_pad = jnp.zeros((1, OUT_LANES), jnp.float32)
    w2_pad = w2_pad.at[0, :STATE_DIM].set(
        w2.reshape(STATE_DIM).astype(jnp.float32))                    # (1, 128)
    b2_2d = b2.reshape(1, 1).astype(jnp.float32)                      # (1, 1) -> SMEM
    return w1x, w1a, b1_pad, w2_pad, b2_2d


def dynamics_forward_slab(x, action, params, *, max_tile=1024):
    """Runs the kernel and returns the raw (b_pad, 128) f32 slab.

    Layout: slab[:B, :64] = new_state, slab[:B, 64] = reward, rest zeros.
    Consumers that can work with this layout should use it directly (or fuse
    into it) to avoid two extra post-kernel HBM passes for slicing.
    """
    w1x, w1a, b1_pad, w2_pad, b2_2d = params
    B = x.shape[0]
    tb, b_pad = _pick_tiling(B, max_tile)

    x = x.astype(jnp.float32)
    action = action.astype(jnp.int32)
    if b_pad != B:   # only hit for non-multiple-of-8 or pathological batches
        x = jnp.pad(x, ((0, b_pad - B), (0, 0)))
        action = jnp.pad(action, (0, b_pad - B))
    act2d = action.reshape(b_pad, 1)

    grid = (b_pad // tb,)
    slab = pl.pallas_call(
        dynamics_kernel,
        out_shape=jax.ShapeDtypeStruct((b_pad, OUT_LANES), jnp.float32),
        grid=grid,
        in_specs=[
            # Row-tiled activations (auto-pipelined across the grid).
            pl.BlockSpec((tb, STATE_DIM), lambda i: (i, 0)),
            pl.BlockSpec((tb, 1), lambda i: (i, 0)),
            # Weights: constant index_map -> loaded once, VMEM-resident.
            pl.BlockSpec((STATE_DIM, OUT_LANES), lambda i: (0, 0)),
            pl.BlockSpec((ACTION_PAD, OUT_LANES), lambda i: (0, 0)),
            pl.BlockSpec((1, OUT_LANES), lambda i: (0, 0)),
            pl.BlockSpec((1, OUT_LANES), lambda i: (0, 0)),
            # Scalar bias in SMEM (no degenerate VMEM tile).
            pl.BlockSpec(memory_space=pltpu.MemorySpace.SMEM),
        ],
        out_specs=pl.BlockSpec((tb, OUT_LANES), lambda i: (i, 0)),
        compiler_params=pltpu.CompilerParams(
            dimension_semantics=("parallel",)),
    )(x, act2d, w1x, w1a, b1_pad, w2_pad, b2_2d)
    return slab


def dynamics_forward(x, action, params, *, max_tile=1024):
    """Convenience API matching the PyTorch module: returns (new_state, reward).

    Note: the post-kernel slices below are ordinary XLA ops (extra HBM reads);
    bandwidth-sensitive callers should consume the slab from
    dynamics_forward_slab() directly instead.
    """
    B = x.shape[0]
    slab = dynamics_forward_slab(x, action, params, max_tile=max_tile)
    new_state = slab[:B, :STATE_DIM]
    reward = slab[:B, REWARD_LANE:REWARD_LANE + 1]
    return new_state, reward


def reference_forward(x, action, w1, b1, w2, b2):
    oh = jax.nn.one_hot(action, ACTION_DIM, dtype=jnp.float32)
    cat = jnp.concatenate([x, oh], axis=-1)
    s = jax.nn.relu(cat @ w1 + b1)
    r = jnp.tanh(s @ w2 + b2)
    return s, r


if __name__ == "__main__":
    key = jax.random.PRNGKey(0)
    kx, ka, k1, k2, k3, k4, kx2, ka2 = jax.random.split(key, 8)

    # Deterministic synthetic parameters (PyTorch Linear shapes, stored (in, out)).
    w1 = jax.random.normal(k1, (STATE_DIM + ACTION_DIM, STATE_DIM), jnp.float32) * 0.1
    b1 = jax.random.normal(k2, (STATE_DIM,), jnp.float32) * 0.1
    w2 = jax.random.normal(k3, (STATE_DIM, 1), jnp.float32) * 0.1
    b2 = jax.random.normal(k4, (1,), jnp.float32) * 0.1

    params = prepare_params(w1, b1, w2, b2)   # one-time prep, reused per call

    # Small batch (single grid step).
    B = 8
    x = jax.random.normal(kx, (B, STATE_DIM), jnp.float32)
    action = jax.random.randint(ka, (B,), 0, ACTION_DIM, jnp.int32)

    new_state, reward = dynamics_forward(x, action, params)
    jax.block_until_ready((new_state, reward))

    ref_state, ref_reward = reference_forward(x, action, w1, b1, w2, b2)
    np.testing.assert_allclose(np.asarray(new_state), np.asarray(ref_state),
                               rtol=1e-5, atol=1e-5)
    np.testing.assert_allclose(np.asarray(reward), np.asarray(ref_reward),
                               rtol=1e-5, atol=1e-5)

    # Larger, non-tile-multiple batch (exercises tiling + ragged-tail padding).
    B2 = 200
    x2 = jax.random.normal(kx2, (B2, STATE_DIM), jnp.float32)
    action2 = jax.random.randint(ka2, (B2,), 0, ACTION_DIM, jnp.int32)

    new_state2, reward2 = dynamics_forward(x2, action2, params)
    jax.block_until_ready((new_state2, reward2))

    ref_state2, ref_reward2 = reference_forward(x2, action2, w1, b1, w2, b2)
    np.testing.assert_allclose(np.asarray(new_state2), np.asarray(ref_state2),
                               rtol=1e-5, atol=1e-5)
    np.testing.assert_allclose(np.asarray(reward2), np.asarray(ref_reward2),
                               rtol=1e-5, atol=1e-5)

    print("KERNEL_OK")
</pallas_src>

<mosaic_0001>
module attributes {stable_mosaic.version = 11 : i64} {
  func.func @dynamics_kernel(%arg0: i32, %arg1: memref<8x64xf32, #tpu.memory_space<vmem>>, %arg2: memref<8x1xi32, #tpu.memory_space<vmem>>, %arg3: memref<64x128xf32, #tpu.memory_space<vmem>>, %arg4: memref<16x128xf32, #tpu.memory_space<vmem>>, %arg5: memref<1x128xf32, #tpu.memory_space<vmem>>, %arg6: memref<1x128xf32, #tpu.memory_space<vmem>>, %arg7: memref<1x1xf32, #tpu.memory_space<smem>>, %arg8: memref<8x128xf32, #tpu.memory_space<vmem>>) attributes {dimension_semantics = [#tpu.dimension_semantics<parallel>], iteration_bounds = array<i64: 1>, scalar_prefetch = 0 : i64, scratch_operands = 0 : i64, tpu.core_type = #tpu.core_type<tc>, window_params = [{transform_indices = @transform_0, window_bounds = array<i64: 8, 64>}, {transform_indices = @transform_1, window_bounds = array<i64: 8, 1>}, {pipeline_mode = #tpu.pipeline_mode<synchronous>, transform_indices = @transform_2, window_bounds = array<i64: 64, 128>}, {pipeline_mode = #tpu.pipeline_mode<synchronous>, transform_indices = @transform_3, window_bounds = array<i64: 16, 128>}, {pipeline_mode = #tpu.pipeline_mode<synchronous>, transform_indices = @transform_4, window_bounds = array<i64: 1, 128>}, {pipeline_mode = #tpu.pipeline_mode<synchronous>, transform_indices = @transform_5, window_bounds = array<i64: 1, 128>}, {transform_indices = @transform_6, window_bounds = array<i64: 1, 1>}, {transform_indices = @transform_7, window_bounds = array<i64: 8, 128>}]} {
    %c0 = arith.constant 0 : index
    %c0_0 = arith.constant 0 : index
    %0 = vector.load %arg1[%c0, %c0_0] : memref<8x64xf32, #tpu.memory_space<vmem>>, vector<8x64xf32>
    %c0_1 = arith.constant 0 : index
    %c0_2 = arith.constant 0 : index
    %1 = vector.load %arg2[%c0_1, %c0_2] : memref<8x1xi32, #tpu.memory_space<vmem>>, vector<8x1xi32>
    %2 = tpu.iota {dimensions = array<i32: 1>} : vector<8x16xi32>
    %3 = vector.broadcast %1 : vector<8x1xi32> to vector<8x16xi32>
    %4 = arith.cmpi eq, %2, %3 : vector<8x16xi32>
    %5 = arith.extui %4 : vector<8x16xi1> to vector<8x16xi32>
    %6 = arith.sitofp %5 : vector<8x16xi32> to vector<8x16xf32>
    %c0_3 = arith.constant 0 : index
    %c0_4 = arith.constant 0 : index
    %7 = vector.load %arg3[%c0_3, %c0_4] : memref<64x128xf32, #tpu.memory_space<vmem>>, vector<64x128xf32>
    %cst = arith.constant dense<0.000000e+00> : vector<8x128xf32>
    %8 = tpu.matmul %0, %7, %cst {dimension_numbers = #tpu.dot_dimension_numbers<[1], [0], [0], [1], [0, 0, 1, 1], [], []>} : vector<8x64xf32>, vector<64x128xf32>, vector<8x128xf32> -> vector<8x128xf32>
    %c0_5 = arith.constant 0 : index
    %c0_6 = arith.constant 0 : index
    %9 = vector.load %arg4[%c0_5, %c0_6] : memref<16x128xf32, #tpu.memory_space<vmem>>, vector<16x128xf32>
    %cst_7 = arith.constant dense<0.000000e+00> : vector<8x128xf32>
    %10 = tpu.matmul %6, %9, %cst_7 {dimension_numbers = #tpu.dot_dimension_numbers<[1], [0], [0], [1], [0, 0, 1, 1], [], []>} : vector<8x16xf32>, vector<16x128xf32>, vector<8x128xf32> -> vector<8x128xf32>
    %11 = arith.addf %8, %10 : vector<8x128xf32>
    %c0_8 = arith.constant 0 : index
    %c0_9 = arith.constant 0 : index
    %12 = vector.load %arg5[%c0_8, %c0_9] : memref<1x128xf32, #tpu.memory_space<vmem>>, vector<1x128xf32>
    %13 = vector.broadcast %12 : vector<1x128xf32> to vector<8x128xf32>
    %14 = arith.addf %11, %13 : vector<8x128xf32>
    %cst_10 = arith.constant 0.000000e+00 : f32
    %15 = vector.broadcast %cst_10 : f32 to vector<8x128xf32>
    %16 = arith.maximumf %14, %15 : vector<8x128xf32>
    %c0_11 = arith.constant 0 : index
    %c0_12 = arith.constant 0 : index
    %17 = vector.load %arg6[%c0_11, %c0_12] : memref<1x128xf32, #tpu.memory_space<vmem>>, vector<1x128xf32>
    %18 = vector.broadcast %17 : vector<1x128xf32> to vector<8x128xf32>
    %19 = arith.mulf %16, %18 : vector<8x128xf32>
    %cst_13 = arith.constant dense<0.000000e+00> : vector<8xf32>
    %20 = vector.multi_reduction <add>, %19, %cst_13 [1] : vector<8x128xf32> to vector<8xf32>
    %21 = vector.shape_cast %20 : vector<8xf32> to vector<8x1xf32>
    %c0_14 = arith.constant 0 : index
    %c0_15 = arith.constant 0 : index
    %22 = memref.load %arg7[%c0_14, %c0_15] : memref<1x1xf32, #tpu.memory_space<smem>>
    %23 = vector.broadcast %22 : f32 to vector<8x1xf32>
    %24 = arith.addf %21, %23 : vector<8x1xf32>
    %25 = math.tanh %24 : vector<8x1xf32>
    %26 = tpu.iota {dimensions = array<i32: 1>} : vector<8x128xi32>
    %c64_i32 = arith.constant 64 : i32
    %27 = vector.broadcast %c64_i32 : i32 to vector<8x128xi32>
    %28 = arith.cmpi eq, %26, %27 : vector<8x128xi32>
    %29 = vector.shape_cast %25 : vector<8x1xf32> to vector<8x1xf32>
    %30 = vector.broadcast %29 : vector<8x1xf32> to vector<8x128xf32>
    %31 = arith.select %28, %30, %16 : vector<8x128xi1>, vector<8x128xf32>
    %c0_16 = arith.constant 0 : index
    %c0_17 = arith.constant 0 : index
    %32 = vector.load %arg8[%c0_16, %c0_17] : memref<8x128xf32, #tpu.memory_space<vmem>>, vector<8x128xf32>
    tpu.vector_store %arg8[%c0_16, %c0_17], %31 {strides = array<i32>} : memref<8x128xf32, #tpu.memory_space<vmem>>, vector<8x128xf32>,
    return
  }
  func.func @transform_0(%arg0: i32) -> (i32, i32) {
    %c0_i32 = arith.constant 0 : i32
    %c0_i32_0 = arith.constant 0 : i32
    return %arg0, %c0_i32 : i32, i32
  }
  func.func @transform_1(%arg0: i32) -> (i32, i32) {
    %c0_i32 = arith.constant 0 : i32
    %c0_i32_0 = arith.constant 0 : i32
    return %arg0, %c0_i32 : i32, i32
  }
  func.func @transform_2(%arg0: i32) -> (i32, i32) {
    %c0_i32 = arith.constant 0 : i32
    %c0_i32_0 = arith.constant 0 : i32
    %c0_i32_1 = arith.constant 0 : i32
    return %c0_i32, %c0_i32_0 : i32, i32
  }
  func.func @transform_3(%arg0: i32) -> (i32, i32) {
    %c0_i32 = arith.constant 0 : i32
    %c0_i32_0 = arith.constant 0 : i32
    %c0_i32_1 = arith.constant 0 : i32
    return %c0_i32, %c0_i32_0 : i32, i32
  }
  func.func @transform_4(%arg0: i32) -> (i32, i32) {
    %c0_i32 = arith.constant 0 : i32
    %c0_i32_0 = arith.constant 0 : i32
    %c0_i32_1 = arith.constant 0 : i32
    return %c0_i32, %c0_i32_0 : i32, i32
  }
  func.func @transform_5(%arg0: i32) -> (i32, i32) {
    %c0_i32 = arith.constant 0 : i32
    %c0_i32_0 = arith.constant 0 : i32
    %c0_i32_1 = arith.constant 0 : i32
    return %c0_i32, %c0_i32_0 : i32, i32
  }
  func.func @transform_6(%arg0: i32) -> (i32, i32) {
    %c0_i32 = arith.constant 0 : i32
    %c0_i32_0 = arith.constant 0 : i32
    %c0_i32_1 = arith.constant 0 : i32
    return %c0_i32, %c0_i32_0 : i32, i32
  }
  func.func @transform_7(%arg0: i32) -> (i32, i32) {
    %c0_i32 = arith.constant 0 : i32
    %c0_i32_0 = arith.constant 0 : i32
    return %arg0, %c0_i32 : i32, i32
  }
}

</mosaic_0001>

<bundles_post_ra>
// kernel: tpu_custom_call.1
= control target key start
LH: loop header
LB: loop body
LE: loop exit
PB: predicated region body
PF: predicated region fallthrough
CT: control target
= control target key end

     0   :  { %13 = vsyncpa [#allocation4], 0  ;;  %s461_s0 = inlined_call_operand.vmem [shape: f32[8,64], index: 0, kind: input, shape index: {}]   ;;  %s462_s1 = inlined_call_operand.vmem [shape: s32[8,1], index: 1, kind: input, shape index: {}]   ;;  %s463_s2 = inlined_call_operand.hbm [shape: f32[64,128], index: 2, kind: input, shape index: {}]   ;;  %s464_s3 = inlined_call_operand.vmem [shape: f32[16,128], index: 3, kind: input, shape index: {}]   ;;  %s465_s4 = inlined_call_operand.vmem [shape: f32[1,128], index: 4, kind: input, shape index: {}]   ;;  %s466_s5 = inlined_call_operand.vmem [shape: f32[1,128], index: 5, kind: input, shape index: {}]   ;;  %s467_s6 = inlined_call_operand.<no memory space> [shape: f32[1,1], index: 6, kind: input, shape index: {}]   ;;  %s468_s7 = inlined_call_operand.hbm [shape: f32[8,128], index: 7, kind: output, shape index: {}]  }
   0x1   :  { %14 = vsyncpa [#allocation5], 0  ;;  %s368_s24 = smov [#allocation3]   ;;  %s320_s28 = scalar_lea.hbm %s463_s2, 1024 }
   0x2   :  { %s24_s25 = sshll.u32 %s368_s24, 4  ;;  %p321_p0 = scmp.ne.s32.totalorder %s463_s2, %s320_s28  ;;  %s25_s25 = int_to_ptr.vmem [resolvable:$true] %s24_s25 }
   0x3   :  { %p324_p1 = scmp.lt.u32.totalorder %s320_s28, %s463_s2 }
   0x5   :  { %p326_p2 = pnand %p324_p1, %p321_p0 }
   0x7   :  { %329 = shalt.err (!%p326_p2)
}
   0x8   :  { %s330_s10 = scalar_lea.vmem %s25_s25, 1024  ;;  %p335_p4 = scmp.lt.s32.totalorder %s25_s25, %s25_s25 }
   0x9   :  { %p331_p3 = scmp.ne.s32.totalorder %s25_s25, %s330_s10  ;;  %p336_p5 = scmp.lt.s32.totalorder %s330_s10, %s330_s10 }
   0xb   :  { %p337_p6 = por %p336_p5, %p335_p4 }
   0xd   :  { %p338_p7 = pnand %p337_p6, %p331_p3 }
   0xf   :  { %341 = shalt.err (!%p338_p7)
}
  0x10   :  { %s369_s11 = smov 128   ;;  %s370_s12 = smov 8  }
  0x11   :  { %30 = dma.hbm_to_vmem [thread:$0]  %s463_s2, 1024, %s25_s25, [#allocation4], %s369_s11, %s369_s11, %s370_s12  }
  0x12   :  { %364 = dma.done.wait [#allocation4], 1024  }
  0x13   :  { %365 = vsyncadd [#allocation4], 4294966272  ;;  %v371_v0 = vmov 0   ;;  %v372_v1 = vmov 0.0|0.0   ;;  %v43_v2 = vld [vmem:[%s462_s1] sm:$0xff]  ;;  %v53_v4 = vld [vmem:[#allocation3 + $0x8] sm:$0xff]  ;;  %v44_v20 = vlaneseq  ;;  %v230_v34 = vstv %s467_s6 }
  0x14   :  { %317 = vset.pattern.permute.xlu0 %v371_v0  ;;  %297 = vmatprep.subr.bf16.mxu1 %v372_v1  ;;  %v52_v3 = vld [vmem:[#allocation3] sm:$0xff]  ;;  %v54_v6 = vld [vmem:[#allocation3 + $0x10] sm:$0xff]  ;;  %v55_v7 = vld [vmem:[#allocation3 + $0x18] sm:$0xff]  ;;  %vm373_vm0 = vmmov 0   ;;  %v374_v8 = vmov 0.0   ;;  %vm136_vm1 = vcmask 523264  }
  0x15   :  { %294 = vmatprep.subr.bf16.mxu0 %v372_v1  ;;  %47 = vperm.xlu0 %317, %v43_v2   ;;  %v298_v5 = vpack.c.bf16 %v53_v4, %v52_v3  ;;  %v301_v9 = vpack.c.bf16 %v55_v7, %v54_v6  ;;  %v60_v10 = vld [vmem:[%s464_s3] sm:$0xff]  ;;  %v61_v11 = vld [vmem:[%s464_s3 + $0x8] sm:$0xff]  ;;  %v58_v16 = vld [vmem:[#allocation3 + $0x30] sm:$0xff]  ;;  %v45_v21 = vand.u32 127, %v44_v20  ;;  %vm62_vm2 = vcmask 130048   ;;  %s375_s25 = smov [#allocation6]  }
  0x16   :  { %291 = vmatprep.mubr.msk.f32.mxu1 %vm373_vm0, %v374_v8  ;;  %272 = vmatprep.mubr.msk.f32.mxu0 %vm373_vm0, %v374_v8  ;;  %v56_v12 = vld [vmem:[#allocation3 + $0x20] sm:$0xff]  ;;  %v57_v13 = vld [vmem:[#allocation3 + $0x28] sm:$0xff]  ;;  %v295_v14 = vpack.c.bf16 %v61_v11, %v60_v10  ;;  %v59_v17 = vld [vmem:[#allocation3 + $0x38] sm:$0xff]  ;;  %s242_s26 = sshll.u32 %s375_s25, 4  ;;  %s243_s26 = int_to_ptr.vmem [resolvable:$true] %s242_s26 }
  0x17   :  { %299 = vmatpush3.bf16.msra.mxu1 %v298_v5  ;;  %v304_v15 = vpack.c.bf16 %v57_v13, %v56_v12  ;;  %v307_v18 = vpack.c.bf16 %v59_v17, %v58_v16  ;;  %v42_v19 = vld [vmem:[%s461_s0] sm:$0xff]  ;;  %vm233_vm4 = vcmp.eq.s32.totalorder %v45_v21, 64  ;;  %p347_p9 = scmp.lt.s32.totalorder %s243_s26, %s243_s26 }
  0x18   :  { %300 = vmatprep.subr.bf16.mxu1 %v372_v1  ;;  %296 = vmatpush3.bf16.msra.mxu0 %v295_v14  ;;  %v254_v27 = vld [vmem:[%s465_s4] ss:$0 sm:$0xff]  ;;  %s342_s4 = scalar_lea.vmem %s243_s26, 128 }
  0x19   :  { %v255_v31 = vld [vmem:[%s466_s5] ss:$0 sm:$0xff]  ;;  %p343_p8 = scmp.ne.s32.totalorder %s243_s26, %s342_s4  ;;  %p348_p10 = scmp.lt.s32.totalorder %s342_s4, %s342_s4 }
  0x1b   :  { %302 = vmatpush3.bf16.msra.mxu1 %v301_v9  ;;  %p349_p11 = por %p348_p10, %p347_p9 }
  0x1c   :  { %303 = vmatprep.subr.bf16.mxu1 %v372_v1 }
  0x1d   :  { %p350_p12 = pnand %p349_p11, %p343_p8 }
  0x1f   :  { %305 = vmatpush3.bf16.msra.mxu1 %v304_v15 }
  0x20   :  { %306 = vmatprep.subr.bf16.mxu1 %v372_v1 }
  0x23   :  { %308 = vmatpush3.bf16.msra.mxu1 %v307_v18 }
  0x26   :  { %292 = vmatmul.mubr.msk.f32.vlgmr.msra.gmra.mrb[0].mxu1 %vm136_vm1, %v42_v19 }
  0x94   :  { %v48_v22 = vpop.permute.xlu0 %47 }
  0x95   :  { %vm49_vm3 = vcmp.eq.s32.totalorder %v45_v21, %v48_v22 }
  0x96   :  { %v251_v23 = vsel %vm49_vm3, 1.0, %v374_v8 }
  0x97   :  { %273 = vmatmul.mubr.msk.f32.vlgmr.msra.gmra.mrb[0].mxu0 %vm62_vm2, %v251_v23 }
  0xf9   :  { %v206_v24 = vpop.f32.mrb[0].mxu1 }
  0xfa   :  { %v293_v25 = vpop.f32.mrb[1].mxu1 }
 0x16a   :  { %v132_v26 = vpop.f32.mrb[0].mxu0 }
 0x16b   :  { %v207_v28 = vadd.f32 %v206_v24, %v132_v26  ;;  %v274_v29 = vpop.f32.mrb[1].mxu0 }
 0x16d   :  { %v217_v30 = vadd.f32 %v254_v27, %v207_v28 }
 0x16f   :  { %v218_v32 = vmax.f32 %v217_v30, 0.0 }
 0x171   :  { %v226_v33 = vmul.f32 %v255_v31, %v218_v32 }
 0x173   :  { %227 = vadd.xlane.f32.xlu0 %v226_v33 }
 0x200   :  { %v228_v35 = vpop.xlane.xlu0 %227 }
 0x201   :  { %v231_v36 = vadd.f32 %v230_v34, %v228_v35 }
 0x203   :  { %318 = vtanh.f32 %v231_v36 }
 0x20d   :  { %v319_v37 = vpop.eup %318 }
 0x20e   :  { %v234_v38 = vsel %vm233_vm4, %v319_v37, %v218_v32 }
 0x20f   :  { %235 = vst [vmem:[#allocation6] sm:$0xff] %v234_v38 }
 0x210   :  { %353 = shalt.err (!%p350_p12)
}
 0x211   :  { %s354_s6 = scalar_lea.hbm %s468_s7, 128 }
 0x212   :  { %p355_p13 = scmp.ne.s32.totalorder %s468_s7, %s354_s6  ;;  %p358_p0 = scmp.lt.u32.totalorder %s354_s6, %s468_s7 }
 0x214   :  { %p360_p1 = pnand %p358_p0, %p355_p13 }
 0x216   :  { %363 = shalt.err (!%p360_p1)
}
 0x217   :  { %245 = dma.vmem_to_hbm [thread:$0]  %s243_s26, 128, %s468_s7, [#allocation5]  }
 0x218   :  { %366 = dma.done.wait [#allocation5], 128  }
 0x219   :  { %367 = vsyncadd [#allocation5], 4294967168 }
 0x21a   :  { %249 = vsyncpa [#allocation4], 1 }
 0x21b   :  { %250 = vsyncpa [#allocation5], 1 }

</bundles_post_ra>
